<compile_context>
chip_gen: v6e
topology: v6e:2x2x1
jax: 0.10.0
libtpu: 0.0.40
codegen_flags: <defaults>
</compile_context>

<pallas_src>
import functools

import jax
import jax.numpy as jnp
from jax.experimental import pallas as pl
from jax.experimental.pallas import tpu as pltpu


def _round_up(x, m):
    return (x + m - 1) // m * m


def _ffn_kernel(x_ref, w1_ref, b1_ref, w2_ref, b2_ref, o_ref, acc_ref):
    # x_ref  : (tm, E)  bf16 row tile
    # w1_ref : (E, th)  bf16 first-layer weight, hidden tile
    # b1_ref : (1, th)  f32
    # w2_ref : (th, E)  bf16 second-layer weight, hidden tile
    # b2_ref : (1, E)   f32
    # o_ref  : (tm, E)  f32 output tile (resident across the k axis)
    # acc_ref: (tm, E)  f32 accumulator scratch
    k = pl.program_id(1)

    @pl.when(k == 0)
    def _():
        acc_ref[...] = jnp.zeros_like(acc_ref)

    # First matmul (bf16 operands, f32 accumulation) + bias + ReLU in f32.
    # ReLU per hidden tile is exact (it is per-hidden-unit).
    h = jnp.dot(x_ref[...], w1_ref[...], preferred_element_type=jnp.float32)
    h = jnp.maximum(h + b1_ref[...], 0.0)

    # Second matmul: bf16 operands on the MXU, accumulate in f32.
    acc_ref[...] += jnp.dot(h.astype(jnp.bfloat16), w2_ref[...],
                            preferred_element_type=jnp.float32)

    @pl.when(k == pl.num_programs(1) - 1)
    def _():
        # b2 is added exactly once, at finalize.
        o_ref[...] = (acc_ref[...] + b2_ref[...]).astype(o_ref.dtype)


@functools.partial(jax.jit, static_argnames=("block_m", "block_h"))
def feed_forward(x, w1, b1, w2, b2, *, block_m=256, block_h=512):
    """Fused MLP forward pass.

    x : (..., E)
    w1: (E, H), b1: (H,)    (weights stored transposed w.r.t. PyTorch)
    w2: (H, E), b2: (E,)
    """
    orig_shape = x.shape
    orig_dtype = x.dtype
    E = x.shape[-1]
    H = w1.shape[1]
    x2d = x.reshape(-1, E)
    M = x2d.shape[0]

    # Lane-dense padding of the embed dim.
    E_pad = _round_up(E, 128)
    # Row tile: multiple of 16 (bf16 sublane packing).
    tm = min(block_m, _round_up(M, 16))
    M_pad = _round_up(M, tm)
    # Hidden (reduction) tile: multiple of 128.
    th = min(block_h, _round_up(H, 128))
    H_pad = _round_up(H, th)

    # Zero-pad operands. Zero padding is exact: padded hidden units give
    # relu(0 + 0) = 0 and contribute nothing through zero rows of W2; padded
    # embed columns / rows are sliced off at the end.
    x_p = jnp.zeros((M_pad, E_pad), jnp.bfloat16).at[:M, :E].set(
        x2d.astype(jnp.bfloat16))
    w1_p = jnp.zeros((E_pad, H_pad), jnp.bfloat16).at[:E, :H].set(
        w1.astype(jnp.bfloat16))
    b1_p = jnp.zeros((1, H_pad), jnp.float32).at[0, :H].set(
        b1.astype(jnp.float32))
    w2_p = jnp.zeros((H_pad, E_pad), jnp.bfloat16).at[:H, :E].set(
        w2.astype(jnp.bfloat16))
    b2_p = jnp.zeros((1, E_pad), jnp.float32).at[0, :E].set(
        b2.astype(jnp.float32))

    grid = (M_pad // tm, H_pad // th)

    flops = 4 * M_pad * H_pad * E_pad  # two matmuls
    bytes_accessed = (x_p.size * 2 + w1_p.size * 2 + w2_p.size * 2
                      + b1_p.size * 4 + b2_p.size * 4 + M_pad * E_pad * 4)

    out = pl.pallas_call(
        _ffn_kernel,
        out_shape=jax.ShapeDtypeStruct((M_pad, E_pad), jnp.float32),
        grid_spec=pltpu.PrefetchScalarGridSpec(
            num_scalar_prefetch=0,
            grid=grid,
            in_specs=[
                pl.BlockSpec((tm, E_pad), lambda i, k: (i, 0)),   # x rows
                pl.BlockSpec((E_pad, th), lambda i, k: (0, k)),   # W1 H-tile
                pl.BlockSpec((1, th),     lambda i, k: (0, k)),   # b1 H-tile
                pl.BlockSpec((th, E_pad), lambda i, k: (k, 0)),   # W2 H-tile
                pl.BlockSpec((1, E_pad),  lambda i, k: (0, 0)),   # b2
            ],
            out_specs=pl.BlockSpec((tm, E_pad), lambda i, k: (i, 0)),
            scratch_shapes=[pltpu.VMEM((tm, E_pad), jnp.float32)],
        ),
        compiler_params=pltpu.CompilerParams(
            dimension_semantics=("parallel", "arbitrary"),
            vmem_limit_bytes=64 * 1024 * 1024,
        ),
        cost_estimate=pl.CostEstimate(
            flops=flops, transcendentals=0, bytes_accessed=bytes_accessed),
    )(x_p, w1_p, b1_p, w2_p, b2_p)

    out = out[:M, :E].astype(orig_dtype)
    return out.reshape(orig_shape)


def init_feed_forward_params(key, embed_size, dtype=jnp.float32):
    """Deterministic init mirroring nn.Linear defaults (U(-1/sqrt(fan_in), +))."""
    hidden = embed_size * 4
    k1, k2, k3, k4 = jax.random.split(key, 4)
    bound1 = 1.0 / (embed_size ** 0.5)
    bound2 = 1.0 / (hidden ** 0.5)
    # Stored transposed relative to PyTorch: (in_features, out_features).
    w1 = jax.random.uniform(k1, (embed_size, hidden), dtype, -bound1, bound1)
    b1 = jax.random.uniform(k2, (hidden,), dtype, -bound1, bound1)
    w2 = jax.random.uniform(k3, (hidden, embed_size), dtype, -bound2, bound2)
    b2 = jax.random.uniform(k4, (embed_size,), dtype, -bound2, bound2)
    return w1, b1, w2, b2


if __name__ == "__main__":
    key = jax.random.PRNGKey(0)
    kx, kp = jax.random.split(key)

    def ref_ffn(x, w1, b1, w2, b2):
        # Dropout is identity in eval mode.
        return jnp.maximum(x @ w1 + b1, 0.0) @ w2 + b2

    # Lane-dense small shapes: batch=2, seq=8, embed=128 (hidden = 512).
    batch, seq, embed = 2, 8, 128
    x = jax.random.normal(kx, (batch, seq, embed), jnp.float32)
    params = init_feed_forward_params(kp, embed)
    out = feed_forward(x, *params)
    jax.block_until_ready(out)
    ref = ref_ffn(x, *params)
    assert out.shape == x.shape
    assert jnp.allclose(out, ref, atol=5e-2, rtol=5e-2), float(
        jnp.max(jnp.abs(out - ref)))

    # Second check with embed=32 to exercise the padding path (E -> 128).
    embed2 = 32
    x2 = jax.random.normal(kx, (batch, seq, embed2), jnp.float32)
    params2 = init_feed_forward_params(kp, embed2)
    out2 = feed_forward(x2, *params2)
    jax.block_until_ready(out2)
    ref2 = ref_ffn(x2, *params2)
    assert out2.shape == x2.shape
    assert jnp.allclose(out2, ref2, atol=5e-2, rtol=5e-2), float(
        jnp.max(jnp.abs(out2 - ref2)))

    print("KERNEL_OK")
</pallas_src>

<mosaic_0001>
module attributes {stable_mosaic.version = 11 : i64} {
  func.func @_ffn_kernel(%arg0: i32, %arg1: i32, %arg2: memref<16x128xbf16, #tpu.memory_space<vmem>>, %arg3: memref<128x512xbf16, #tpu.memory_space<vmem>>, %arg4: memref<1x512xf32, #tpu.memory_space<vmem>>, %arg5: memref<512x128xbf16, #tpu.memory_space<vmem>>, %arg6: memref<1x128xf32, #tpu.memory_space<vmem>>, %arg7: memref<16x128xf32, #tpu.memory_space<vmem>>, %arg8: memref<16x128xf32, #tpu.memory_space<vmem>>) attributes {dimension_semantics = [#tpu.dimension_semantics<parallel>, #tpu.dimension_semantics<arbitrary>], iteration_bounds = array<i64: 1, 1>, scalar_prefetch = 0 : i64, scratch_operands = 1 : i64, tpu.core_type = #tpu.core_type<tc>, window_params = [{transform_indices = @transform_0, window_bounds = array<i64: 16, 128>}, {transform_indices = @transform_1, window_bounds = array<i64: 128, 512>}, {transform_indices = @transform_2, window_bounds = array<i64: 1, 512>}, {transform_indices = @transform_3, window_bounds = array<i64: 512, 128>}, {pipeline_mode = #tpu.pipeline_mode<synchronous>, transform_indices = @transform_4, window_bounds = array<i64: 1, 128>}, {transform_indices = @transform_5, window_bounds = array<i64: 16, 128>}]} {
    %c0_i32 = arith.constant 0 : i32
    %0 = arith.cmpi eq, %arg1, %c0_i32 : i32
    %1 = arith.extui %0 : i1 to i32
    %c0_i32_0 = arith.constant 0 : i32
    %2 = arith.cmpi ne, %1, %c0_i32_0 : i32
    scf.if %2 {
      %cst_16 = arith.constant 0.000000e+00 : f32
      %20 = vector.broadcast %cst_16 : f32 to vector<16x128xf32>
      %c0_17 = arith.constant 0 : index
      %c0_18 = arith.constant 0 : index
      %21 = vector.load %arg8[%c0_17, %c0_18] : memref<16x128xf32, #tpu.memory_space<vmem>>, vector<16x128xf32>
      tpu.vector_store %arg8[%c0_17, %c0_18], %20 {strides = array<i32>} : memref<16x128xf32, #tpu.memory_space<vmem>>, vector<16x128xf32>,
    } else {
    }
    %c0 = arith.constant 0 : index
    %c0_1 = arith.constant 0 : index
    %3 = vector.load %arg2[%c0, %c0_1] : memref<16x128xbf16, #tpu.memory_space<vmem>>, vector<16x128xbf16>
    %c0_2 = arith.constant 0 : index
    %c0_3 = arith.constant 0 : index
    %4 = vector.load %arg3[%c0_2, %c0_3] : memref<128x512xbf16, #tpu.memory_space<vmem>>, vector<128x512xbf16>
    %cst = arith.constant dense<0.000000e+00> : vector<16x512xf32>
    %5 = tpu.matmul %3, %4, %cst {dimension_numbers = #tpu.dot_dimension_numbers<[1], [0], [0], [1], [0, 0, 1, 1], [], []>} : vector<16x128xbf16>, vector<128x512xbf16>, vector<16x512xf32> -> vector<16x512xf32>
    %c0_4 = arith.constant 0 : index
    %c0_5 = arith.constant 0 : index
    %6 = vector.load %arg4[%c0_4, %c0_5] : memref<1x512xf32, #tpu.memory_space<vmem>>, vector<1x512xf32>
    %7 = vector.broadcast %6 : vector<1x512xf32> to vector<16x512xf32>
    %8 = arith.addf %5, %7 : vector<16x512xf32>
    %cst_6 = arith.constant 0.000000e+00 : f32
    %9 = vector.broadcast %cst_6 : f32 to vector<16x512xf32>
    %10 = arith.maximumf %8, %9 : vector<16x512xf32>
    %c0_7 = arith.constant 0 : index
    %c0_8 = arith.constant 0 : index
    %11 = vector.load %arg8[%c0_7, %c0_8] : memref<16x128xf32, #tpu.memory_space<vmem>>, vector<16x128xf32>
    %12 = arith.truncf %10 : vector<16x512xf32> to vector<16x512xbf16>
    %c0_9 = arith.constant 0 : index
    %c0_10 = arith.constant 0 : index
    %13 = vector.load %arg5[%c0_9, %c0_10] : memref<512x128xbf16, #tpu.memory_space<vmem>>, vector<512x128xbf16>
    %cst_11 = arith.constant dense<0.000000e+00> : vector<16x128xf32>
    %14 = tpu.matmul %12, %13, %cst_11 {dimension_numbers = #tpu.dot_dimension_numbers<[1], [0], [0], [1], [0, 0, 1, 1], [], []>} : vector<16x512xbf16>, vector<512x128xbf16>, vector<16x128xf32> -> vector<16x128xf32>
    %15 = arith.addf %11, %14 : vector<16x128xf32>
    %c0_12 = arith.constant 0 : index
    %c0_13 = arith.constant 0 : index
    %16 = vector.load %arg8[%c0_12, %c0_13] : memref<16x128xf32, #tpu.memory_space<vmem>>, vector<16x128xf32>
    tpu.vector_store %arg8[%c0_12, %c0_13], %15 {strides = array<i32>} : memref<16x128xf32, #tpu.memory_space<vmem>>, vector<16x128xf32>,
    %c0_i32_14 = arith.constant 0 : i32
    %17 = arith.cmpi eq, %arg1, %c0_i32_14 : i32
    %18 = arith.extui %17 : i1 to i32
    %c0_i32_15 = arith.constant 0 : i32
    %19 = arith.cmpi ne, %18, %c0_i32_15 : i32
    scf.if %19 {
      %c0_16 = arith.constant 0 : index
      %c0_17 = arith.constant 0 : index
      %20 = vector.load %arg8[%c0_16, %c0_17] : memref<16x128xf32, #tpu.memory_space<vmem>>, vector<16x128xf32>
      %c0_18 = arith.constant 0 : index
      %c0_19 = arith.constant 0 : index
      %21 = vector.load %arg6[%c0_18, %c0_19] : memref<1x128xf32, #tpu.memory_space<vmem>>, vector<1x128xf32>
      %22 = vector.broadcast %21 : vector<1x128xf32> to vector<16x128xf32>
      %23 = arith.addf %20, %22 : vector<16x128xf32>
      %c0_20 = arith.constant 0 : index
      %c0_21 = arith.constant 0 : index
      %24 = vector.load %arg7[%c0_20, %c0_21] : memref<16x128xf32, #tpu.memory_space<vmem>>, vector<16x128xf32>
      tpu.vector_store %arg7[%c0_20, %c0_21], %23 {strides = array<i32>} : memref<16x128xf32, #tpu.memory_space<vmem>>, vector<16x128xf32>,
    } else {
    }
    return
  }
  func.func @transform_0(%arg0: i32, %arg1: i32) -> (i32, i32) {
    %c0_i32 = arith.constant 0 : i32
    %c0_i32_0 = arith.constant 0 : i32
    return %arg0, %c0_i32 : i32, i32
  }
  func.func @transform_1(%arg0: i32, %arg1: i32) -> (i32, i32) {
    %c0_i32 = arith.constant 0 : i32
    %c0_i32_0 = arith.constant 0 : i32
    return %c0_i32, %arg1 : i32, i32
  }
  func.func @transform_2(%arg0: i32, %arg1: i32) -> (i32, i32) {
    %c0_i32 = arith.constant 0 : i32
    %c0_i32_0 = arith.constant 0 : i32
    return %c0_i32, %arg1 : i32, i32
  }
  func.func @transform_3(%arg0: i32, %arg1: i32) -> (i32, i32) {
    %c0_i32 = arith.constant 0 : i32
    %c0_i32_0 = arith.constant 0 : i32
    return %arg1, %c0_i32 : i32, i32
  }
  func.func @transform_4(%arg0: i32, %arg1: i32) -> (i32, i32) {
    %c0_i32 = arith.constant 0 : i32
    %c0_i32_0 = arith.constant 0 : i32
    %c0_i32_1 = arith.constant 0 : i32
    return %c0_i32, %c0_i32_0 : i32, i32
  }
  func.func @transform_5(%arg0: i32, %arg1: i32) -> (i32, i32) {
    %c0_i32 = arith.constant 0 : i32
    %c0_i32_0 = arith.constant 0 : i32
    return %arg0, %c0_i32 : i32, i32
  }
}

</mosaic_0001>

<bundles_post_ra>
// kernel: feed_forward.1
= control target key start
LH: loop header
LB: loop body
LE: loop exit
PB: predicated region body
PF: predicated region fallthrough
CT: control target
= control target key end

     0   :  { %v941_v2 = vmov 0   ;;  %s1179_s0 = inlined_call_operand.vmem [shape: bf16[16,128], index: 0, kind: input, shape index: {}]   ;;  %s1180_s1 = inlined_call_operand.vmem [shape: bf16[128,512], index: 1, kind: input, shape index: {}]   ;;  %s1181_s2 = inlined_call_operand.vmem [shape: f32[1,512], index: 2, kind: input, shape index: {}]   ;;  %s1182_s3 = inlined_call_operand.vmem [shape: bf16[512,128], index: 3, kind: input, shape index: {}]   ;;  %s1183_s4 = inlined_call_operand.vmem [shape: f32[1,128], index: 4, kind: input, shape index: {}]   ;;  %s1184_s5 = inlined_call_operand.hbm [shape: f32[16,128], index: 5, kind: output, shape index: {}]  }
   0x1   :  { %v838_v0 = vld [vmem:[%s1180_s1 + $0xe4] ss:$16 sps:$4 sm:$0xff]   ;;  %v840_v1 = vld [vmem:[%s1180_s1 + $0xec] ss:$16 sps:$4 sm:$0xff]   ;;  %282 = vmatprep.mubr.bf16.mxu0 %v941_v2  ;;  %325 = vmatprep.mubr.bf16.mxu1 %v941_v2  ;;  %v842_v3 = vld [vmem:[%s1180_s1 + $0xe0] ss:$16 sps:$4 sm:$0xff]  }
   0x2   :  { %250 = vmatprep.subr.bf16.mxu0 %v838_v0  ;;  %v843_v4 = vld [vmem:[%s1180_s1 + $0xe8] ss:$16 sps:$4 sm:$0xff]   ;;  %293 = vmatprep.subr.bf16.mxu1 %v840_v1  ;;  %v844_v5 = vld [vmem:[%s1180_s1 + $0xc4] ss:$16 sps:$4 sm:$0xff]   ;;  %v846_v6 = vld [vmem:[%s1180_s1 + $0xcc] ss:$16 sps:$4 sm:$0xff]  }
   0x3   :  { %251 = vmatpush1.bf16.msra.mxu0 %v842_v3  ;;  %294 = vmatpush1.bf16.msra.mxu1 %v843_v4  ;;  %v848_v7 = vld [vmem:[%s1180_s1 + $0xc0] ss:$16 sps:$4 sm:$0xff]   ;;  %v849_v8 = vld [vmem:[%s1180_s1 + $0xc8] ss:$16 sps:$4 sm:$0xff]   ;;  %v850_v9 = vld [vmem:[%s1180_s1 + $0xa4] ss:$16 sps:$4 sm:$0xff]  }
   0x4   :  { %252 = vmatprep.subr.bf16.mxu0 %v844_v5  ;;  %295 = vmatprep.subr.bf16.mxu1 %v846_v6  ;;  %v852_v10 = vld [vmem:[%s1180_s1 + $0xac] ss:$16 sps:$4 sm:$0xff]   ;;  %v854_v11 = vld [vmem:[%s1180_s1 + $0xa0] ss:$16 sps:$4 sm:$0xff]   ;;  %v855_v12 = vld [vmem:[%s1180_s1 + $0xa8] ss:$16 sps:$4 sm:$0xff]  }
   0x5   :  { %v856_v13 = vld [vmem:[%s1180_s1 + $0x84] ss:$16 sps:$4 sm:$0xff]   ;;  %v858_v14 = vld [vmem:[%s1180_s1 + $0x8c] ss:$16 sps:$4 sm:$0xff]   ;;  %v860_v15 = vld [vmem:[%s1180_s1 + $0x80] ss:$16 sps:$4 sm:$0xff]  }
   0x6   :  { %v861_v16 = vld [vmem:[%s1180_s1 + $0x88] ss:$16 sps:$4 sm:$0xff]   ;;  %v862_v17 = vld [vmem:[%s1180_s1 + $0x64] ss:$16 sps:$4 sm:$0xff]   ;;  %v864_v18 = vld [vmem:[%s1180_s1 + $0x6c] ss:$16 sps:$4 sm:$0xff]  }
   0x7   :  { %253 = vmatpush1.bf16.msra.mxu0 %v848_v7  ;;  %296 = vmatpush1.bf16.msra.mxu1 %v849_v8  ;;  %v866_v19 = vld [vmem:[%s1180_s1 + $0x60] ss:$16 sps:$4 sm:$0xff]   ;;  %v867_v20 = vld [vmem:[%s1180_s1 + $0x68] ss:$16 sps:$4 sm:$0xff]   ;;  %v868_v21 = vld [vmem:[%s1180_s1 + $0x44] ss:$16 sps:$4 sm:$0xff]  }
   0x8   :  { %254 = vmatprep.subr.bf16.mxu0 %v850_v9  ;;  %297 = vmatprep.subr.bf16.mxu1 %v852_v10  ;;  %v870_v22 = vld [vmem:[%s1180_s1 + $0x4c] ss:$16 sps:$4 sm:$0xff]   ;;  %v872_v23 = vld [vmem:[%s1180_s1 + $0x40] ss:$16 sps:$4 sm:$0xff]   ;;  %v873_v24 = vld [vmem:[%s1180_s1 + $0x48] ss:$16 sps:$4 sm:$0xff]  }
   0x9   :  { %v874_v25 = vld [vmem:[%s1180_s1 + $0x24] ss:$16 sps:$4 sm:$0xff]   ;;  %v876_v26 = vld [vmem:[%s1180_s1 + $0x2c] ss:$16 sps:$4 sm:$0xff]   ;;  %v878_v27 = vld [vmem:[%s1180_s1 + $0x20] ss:$16 sps:$4 sm:$0xff]  }
   0xa   :  { %v879_v28 = vld [vmem:[%s1180_s1 + $0x28] ss:$16 sps:$4 sm:$0xff]   ;;  %v880_v29 = vld [vmem:[%s1180_s1 + $0x4] ss:$16 sps:$4 sm:$0xff]   ;;  %v882_v30 = vld [vmem:[%s1180_s1 + $0xc] ss:$16 sps:$4 sm:$0xff]  }
   0xb   :  { %255 = vmatpush1.bf16.msra.mxu0 %v854_v11  ;;  %298 = vmatpush1.bf16.msra.mxu1 %v855_v12  ;;  %v884_v31 = vld [vmem:[%s1180_s1] ss:$16 sps:$4 sm:$0xff]   ;;  %v885_v32 = vld [vmem:[%s1180_s1 + $0x8] ss:$16 sps:$4 sm:$0xff]  }
   0xc   :  { %256 = vmatprep.subr.bf16.mxu0 %v856_v13  ;;  %299 = vmatprep.subr.bf16.mxu1 %v858_v14  ;;  %v887_v33 = vld [vmem:[%s1182_s3 + $0x78] sm:$0xff]   ;;  %v886_v34 = vld [vmem:[%s1179_s0] sm:$0xff]   ;;  %v891_v38 = vld [vmem:[%s1182_s3 + $0x70] sm:$0xff]  }
   0xd   :  { %v888_v35 = vld [vmem:[%s1182_s3 + $0xf8] sm:$0xff]   ;;  %v892_v39 = vld [vmem:[%s1182_s3 + $0xf0] sm:$0xff]   ;;  %v895_v42 = vld [vmem:[%s1182_s3 + $0x68] sm:$0xff]  }
   0xe   :  { %v889_v36 = vld [vmem:[%s1182_s3 + $0x38] sm:$0xff]   ;;  %v893_v40 = vld [vmem:[%s1182_s3 + $0x30] sm:$0xff]   ;;  %v896_v43 = vld [vmem:[%s1182_s3 + $0xe8] sm:$0xff]  }
   0xf   :  { %257 = vmatpush1.bf16.msra.mxu0 %v860_v15  ;;  %300 = vmatpush1.bf16.msra.mxu1 %v861_v16  ;;  %v890_v37 = vld [vmem:[%s1182_s3 + $0xb8] sm:$0xff]   ;;  %v894_v41 = vld [vmem:[%s1182_s3 + $0xb0] sm:$0xff]   ;;  %v897_v44 = vld [vmem:[%s1182_s3 + $0x28] sm:$0xff]  }
  0x10   :  { %258 = vmatprep.subr.bf16.mxu0 %v862_v17  ;;  %301 = vmatprep.subr.bf16.mxu1 %v864_v18  ;;  %v898_v45 = vld [vmem:[%s1182_s3 + $0xa8] sm:$0xff]   ;;  %v899_v46 = vld [vmem:[%s1182_s3 + $0x60] sm:$0xff]   ;;  %v903_v50 = vld [vmem:[%s1182_s3 + $0x58] sm:$0xff]  }
  0x11   :  { %v900_v47 = vld [vmem:[%s1182_s3 + $0xe0] sm:$0xff]   ;;  %v904_v51 = vld [vmem:[%s1182_s3 + $0xd8] sm:$0xff]  }
  0x12   :  { %v901_v48 = vld [vmem:[%s1182_s3 + $0x20] sm:$0xff]   ;;  %v905_v52 = vld [vmem:[%s1182_s3 + $0x18] sm:$0xff]  }
  0x13   :  { %259 = vmatpush1.bf16.msra.mxu0 %v866_v19  ;;  %302 = vmatpush1.bf16.msra.mxu1 %v867_v20  ;;  %v902_v49 = vld [vmem:[%s1182_s3 + $0xa0] sm:$0xff]   ;;  %v906_v53 = vld [vmem:[%s1182_s3 + $0x98] sm:$0xff]  }
  0x14   :  { %260 = vmatprep.subr.bf16.mxu0 %v868_v21  ;;  %303 = vmatprep.subr.bf16.mxu1 %v870_v22 }
  0x17   :  { %261 = vmatpush1.bf16.msra.mxu0 %v872_v23  ;;  %304 = vmatpush1.bf16.msra.mxu1 %v873_v24 }
  0x18   :  { %262 = vmatprep.subr.bf16.mxu0 %v874_v25  ;;  %305 = vmatprep.subr.bf16.mxu1 %v876_v26 }
  0x1b   :  { %263 = vmatpush1.bf16.msra.mxu0 %v878_v27  ;;  %306 = vmatpush1.bf16.msra.mxu1 %v879_v28 }
  0x1c   :  { %264 = vmatprep.subr.bf16.mxu0 %v880_v29  ;;  %307 = vmatprep.subr.bf16.mxu1 %v882_v30 }
  0x1f   :  { %265 = vmatpush1.bf16.msra.mxu0 %v884_v31  ;;  %308 = vmatpush1.bf16.msra.mxu1 %v885_v32 }
  0x20   :  { %790 = vmatprep.subr.bf16.mxu0 %v887_v33  ;;  %812 = vmatprep.subr.bf16.mxu1 %v888_v35 }
  0x22   :  { %283 = vmatmul.mubr.bf16.vlgmr.msra.gmra.mxu0 %v886_v34  ;;  %326 = vmatmul.mubr.bf16.vlgmr.msra.gmra.mxu1 %v886_v34 }
  0x23   :  { %791 = vmatpush3.bf16.msra.mxu0 %v889_v36  ;;  %813 = vmatpush3.bf16.msra.mxu1 %v890_v37 }
  0x24   :  { %792 = vmatprep.subr.bf16.mxu0 %v891_v38  ;;  %814 = vmatprep.subr.bf16.mxu1 %v892_v39 }
  0x27   :  { %793 = vmatpush3.bf16.msra.mxu0 %v893_v40  ;;  %815 = vmatpush3.bf16.msra.mxu1 %v894_v41 }
  0x28   :  { %794 = vmatprep.subr.bf16.mxu0 %v895_v42  ;;  %816 = vmatprep.subr.bf16.mxu1 %v896_v43 }
  0x2b   :  { %795 = vmatpush3.bf16.msra.mxu0 %v897_v44  ;;  %817 = vmatpush3.bf16.msra.mxu1 %v898_v45 }
  0x2c   :  { %796 = vmatprep.subr.bf16.mxu0 %v899_v46  ;;  %818 = vmatprep.subr.bf16.mxu1 %v900_v47 }
  0x2f   :  { %797 = vmatpush3.bf16.msra.mxu0 %v901_v48  ;;  %819 = vmatpush3.bf16.msra.mxu1 %v902_v49 }
  0x30   :  { %798 = vmatprep.subr.bf16.mxu0 %v903_v50  ;;  %820 = vmatprep.subr.bf16.mxu1 %v904_v51 }
  0x31   :  { %10 = vsyncpa [#allocation4], 0  ;;  %v907_v54 = vld [vmem:[%s1182_s3 + $0x50] sm:$0xff]   ;;  %v911_v58 = vld [vmem:[%s1182_s3 + $0x48] sm:$0xff]   ;;  %v64_v2 = vlaneseq  ;;  %s942_s19 = smov [#allocation3]  }
  0x32   :  { %v908_v55 = vld [vmem:[%s1182_s3 + $0xd0] sm:$0xff]   ;;  %v912_v59 = vld [vmem:[%s1182_s3 + $0xc8] sm:$0xff]   ;;  %v915_v62 = vld [vmem:[%s1182_s3 + $0x40] sm:$0xff]   ;;  %s713_s20 = sshll.u32 %s942_s19, 4  ;;  %s714_s20 = int_to_ptr.vmem [resolvable:$true] %s713_s20 }
  0x33   :  { %799 = vmatpush3.bf16.msra.mxu0 %v905_v52  ;;  %821 = vmatpush3.bf16.msra.mxu1 %v906_v53  ;;  %v909_v56 = vld [vmem:[%s1182_s3 + $0x10] sm:$0xff]   ;;  %v913_v60 = vld [vmem:[%s1182_s3 + $0x8] sm:$0xff]   ;;  %v916_v63 = vld [vmem:[%s1182_s3 + $0xc0] sm:$0xff]   ;;  %v65_v3 = vshrl.u32 %v64_v2, 7  ;;  %s919_s21 = scalar_lea.vmem %s714_s20, 256  ;;  %p924_p1 = scmp.lt.s32.totalorder %s714_s20, %s714_s20 }
  0x34   :  { %v910_v57 = vld [vmem:[%s1182_s3 + $0x90] sm:$0xff]   ;;  %800 = vmatprep.subr.bf16.mxu0 %v907_v54  ;;  %822 = vmatprep.subr.bf16.mxu1 %v908_v55  ;;  %v914_v61 = vld [vmem:[%s1182_s3 + $0x88] sm:$0xff]   ;;  %v917_v0 = vld [vmem:[%s1182_s3] sm:$0xff]   ;;  %p920_p0 = scmp.ne.s32.totalorder %s714_s20, %s919_s21  ;;  %p925_p2 = scmp.lt.s32.totalorder %s919_s21, %s919_s21 }
  0x35   :  { %v918_v1 = vld [vmem:[%s1182_s3 + $0x80] sm:$0xff]   ;;  %v70_v4 = vsub.s32 1, %v65_v3  ;;  %v78_v5 = vsub.s32 3, %v65_v3  ;;  %v66_v6 = vsub.s32 0, %v65_v3  ;;  %v74_v7 = vsub.s32 2, %v65_v3 }
  0x36   :  { %v62_v8 = vld [vmem:[%s1181_s2] sm:$0xf]  ;;  %p926_p3 = por %p925_p2, %p924_p1 }
  0x37   :  { %801 = vmatpush3.bf16.msra.mxu0 %v909_v56  ;;  %823 = vmatpush3.bf16.msra.mxu1 %v910_v57  ;;  %v71_v11 = vrot.slane %v62_v8, %v70_v4  ;;  %v79_v12 = vrot.slane %v62_v8, %v78_v5  ;;  %v67_v13 = vrot.slane %v62_v8, %v66_v6  ;;  %v789_v47 = vld [vmem:[%s1183_s4] ss:$0 sm:$0xff] }
  0x38   :  { %802 = vmatprep.subr.bf16.mxu0 %v911_v58  ;;  %824 = vmatprep.subr.bf16.mxu1 %v912_v59  ;;  %v75_v14 = vrot.slane %v62_v8, %v74_v7  ;;  %p927_p4 = pnand %p926_p3, %p920_p0 }
  0x3b   :  { %803 = vmatpush3.bf16.msra.mxu0 %v913_v60  ;;  %825 = vmatpush3.bf16.msra.mxu1 %v914_v61 }
  0x3c   :  { %804 = vmatprep.subr.bf16.mxu0 %v915_v62  ;;  %826 = vmatprep.subr.bf16.mxu1 %v916_v63 }
  0x3f   :  { %805 = vmatpush3.bf16.msra.mxu0 %v917_v0  ;;  %827 = vmatpush3.bf16.msra.mxu1 %v918_v1 }
  0xe2   :  { %v284_v9 = vpop.f32.mrf.mxu0  ;;  %v327_v10 = vpop.f32.mrf.mxu1 }
  0xe3   :  { %v285_v23 = vadd.f32 %v284_v9, %v67_v13  ;;  %v328_v24 = vadd.f32 %v327_v10, %v75_v14 }
  0xe4   :  { %v286_v15 = vpop.f32.mrf.mxu0  ;;  %v329_v16 = vpop.f32.mrf.mxu1 }
  0xe5   :  { %v287_v19 = vadd.f32 %v286_v15, %v71_v11  ;;  %v330_v20 = vadd.f32 %v329_v16, %v79_v12  ;;  %v336_v35 = vmax.f32 %v285_v23, 0.0  ;;  %v338_v36 = vmax.f32 %v328_v24, 0.0 }
  0xe6   :  { %v288_v17 = vpop.f32.mrf.mxu0  ;;  %v331_v18 = vpop.f32.mrf.mxu1 }
  0xe7   :  { %v289_v21 = vadd.f32 %v288_v17, %v67_v13  ;;  %v332_v22 = vadd.f32 %v331_v18, %v75_v14  ;;  %v337_v31 = vmax.f32 %v287_v19, 0.0  ;;  %v339_v32 = vmax.f32 %v330_v20, 0.0 }
  0xe8   :  { %v290_v25 = vpop.f32.mrf.mxu0  ;;  %v333_v26 = vpop.f32.mrf.mxu1 }
  0xe9   :  { %v291_v27 = vadd.f32 %v290_v25, %v71_v11  ;;  %v334_v28 = vadd.f32 %v333_v26, %v79_v12  ;;  %v340_v29 = vmax.f32 %v289_v21, 0.0  ;;  %v342_v30 = vmax.f32 %v332_v22, 0.0 }
  0xeb   :  { %v341_v33 = vmax.f32 %v291_v27, 0.0  ;;  %v343_v34 = vmax.f32 %v334_v28, 0.0  ;;  %v346_v39 = vpack.c.bf16 %v340_v29, %v336_v35  ;;  %v348_v40 = vpack.c.bf16 %v342_v30, %v338_v36 }
  0xed   :  { %v347_v37 = vpack.c.bf16 %v341_v33, %v337_v31  ;;  %v349_v38 = vpack.c.bf16 %v343_v34, %v339_v32 }
  0xef   :  { %638 = vmatprep.mubr.bf16.mxu0 %v347_v37  ;;  %679 = vmatprep.mubr.bf16.mxu1 %v349_v38 }
  0xf0   :  { %639 = vmatmul.mubr.bf16.vlgmr.msra.gmra.mxu0 %v346_v39  ;;  %680 = vmatmul.mubr.bf16.vlgmr.msra.gmra.mxu1 %v348_v40 }
 0x1b0   :  { %v806_v41 = vpop.f32.mrf.mxu0  ;;  %v828_v42 = vpop.f32.mrf.mxu1 }
 0x1b2   :  { %v807_v43 = vpop.f32.mrf.mxu0  ;;  %v829_v44 = vpop.f32.mrf.mxu1 }
 0x1b3   :  { %v808_v45 = vadd.f32 %v807_v43, %v806_v41  ;;  %v830_v46 = vadd.f32 %v829_v44, %v828_v42 }
 0x1b4   :  { %v809_v48 = vpop.f32.mrf.mxu0  ;;  %v831_v49 = vpop.f32.mrf.mxu1 }
 0x1b5   :  { %v682_v50 = vadd.f32 %v830_v46, %v808_v45 }
 0x1b6   :  { %v810_v51 = vpop.f32.mrf.mxu0  ;;  %v832_v52 = vpop.f32.mrf.mxu1 }
 0x1b7   :  { %v704_v53 = vadd.f32 %v789_v47, %v682_v50  ;;  %v811_v54 = vadd.f32 %v810_v51, %v809_v48  ;;  %v833_v55 = vadd.f32 %v832_v52, %v831_v49 }
 0x1b9   :  { %706 = vst [vmem:[#allocation3] sm:$0xff] %v704_v53  ;;  %v685_v56 = vadd.f32 %v833_v55, %v811_v54 }
 0x1bb   :  { %v705_v57 = vadd.f32 %v789_v47, %v685_v56 }
 0x1bd   :  { %707 = vst [vmem:[#allocation3 + $0x8] sm:$0xff] %v705_v57 }
 0x1be   :  { %930 = shalt.err (!%p927_p4)
}
 0x1bf   :  { %s943_s4 = smov 128   ;;  %s944_s22 = smov 8  }
 0x1c0   :  { %719 = dma.vmem_to_hbm [thread:$0]  %s714_s20, 256, %s1184_s5, [#allocation4], %s943_s4, %s943_s4, %s944_s22  }
 0x1c1   :  { %939 = dma.done.wait [#allocation4], 256  }
 0x1c2   :  { %940 = vsyncadd [#allocation4], 4294967040 }
 0x1c3   :  { %723 = vsyncpa [#allocation4], 1 }

</bundles_post_ra>
